<compile_context>
chip_gen: v6e
topology: v6e:2x2x1
jax: 0.10.0
libtpu: 0.0.40
codegen_flags: <defaults>
</compile_context>

<pallas_src>
import functools

import jax
import jax.numpy as jnp
from jax.experimental import pallas as pl
from jax.experimental.pallas import tpu as pltpu

_LANE = 128


def _round_up(a, b):
    return (a + b - 1) // b * b


def _gap_kernel(x_ref, o_ref, acc_ref, *, inv_hw, hw, hw_tile, mask_tail):
    # grid = (row_tiles, hw_tiles); axis 1 is the spatial reduction ("arbitrary").
    k = pl.program_id(1)

    @pl.when(k == 0)
    def _init():
        acc_ref[...] = jnp.zeros_like(acc_ref)

    x = x_ref[...]
    if mask_tail:
        # Static flag: only emitted when hw % hw_tile != 0.  Zeroes the padded lanes of
        # the ragged last spatial block so garbage never reaches the accumulator.
        lane = jax.lax.broadcasted_iota(jnp.int32, x.shape, 1)
        x = jnp.where(k * hw_tile + lane < hw, x, 0)

    # Widen to f32 inside the reduction (no materialized f32 copy of the tile).
    acc_ref[...] += jnp.sum(x, axis=1, keepdims=True, dtype=jnp.float32)

    @pl.when(k == pl.num_programs(1) - 1)
    def _finalize():
        o_ref[...] = (acc_ref[...] * inv_hw).astype(o_ref.dtype)


def global_avg_pool_2d(x):
    """x: (N, C, H, W) -> (N, C), mean over H*W (matches PyTorch view + mean(dim=2))."""
    n, c, h, w = x.shape
    rows = n * c
    hw = h * w
    x2d = x.reshape(rows, hw)

    itemsize = jnp.dtype(x.dtype).itemsize
    # Sublane packing factor: 8 rows for 4-byte, 16 for bf16/f16, 32 for 1-byte dtypes.
    sub = max(8, 32 // itemsize)
    # ~4 MiB per input block; double-buffered it stays well inside scoped-VMEM budgets.
    tile_budget = 4 * 1024 * 1024

    # ---- spatial (reduction-axis) tile: 128-multiple, bounded by the budget for one
    # packed row group; cdiv grid + in-kernel mask handle any ragged tail.
    hw_padded = _round_up(hw, _LANE)
    max_hw_tile = max(_LANE, (tile_budget // (sub * itemsize)) // _LANE * _LANE)
    hw_tile = min(hw_padded, max_hw_tile)
    n_hw = pl.cdiv(hw, hw_tile)
    mask_tail = (hw % hw_tile) != 0

    # ---- row tile: as many (batch, channel) rows as fit the budget, rounded to the
    # sublane packing factor; cdiv grid drops the padded rows on writeback.
    tr = (tile_budget // (hw_tile * itemsize)) // sub * sub
    tr = max(sub, min(tr, 4096, _round_up(rows, sub)))
    n_rows = pl.cdiv(rows, tr)

    tile_bytes = tr * hw_tile * itemsize
    # Explicit scoped-VMEM budget: double-buffered input block + accumulator/output,
    # capped so it fits v7x's 64 MiB physical VMEM with headroom.
    vmem_limit = int(min(48 * 1024 * 1024, max(32 * 1024 * 1024, 4 * tile_bytes)))

    kernel = functools.partial(
        _gap_kernel, inv_hw=1.0 / hw, hw=hw, hw_tile=hw_tile, mask_tail=mask_tail
    )

    out2d = pl.pallas_call(
        kernel,
        out_shape=jax.ShapeDtypeStruct((rows, 1), x.dtype),
        grid_spec=pltpu.PrefetchScalarGridSpec(
            num_scalar_prefetch=0,
            grid=(n_rows, n_hw),
            in_specs=[pl.BlockSpec((tr, hw_tile), lambda i, k: (i, k))],
            out_specs=pl.BlockSpec((tr, 1), lambda i, k: (i, 0)),
            scratch_shapes=[pltpu.VMEM((tr, 1), jnp.float32)],
        ),
        compiler_params=pltpu.CompilerParams(
            dimension_semantics=("parallel", "arbitrary"),
            vmem_limit_bytes=vmem_limit,
        ),
    )(x2d)

    return out2d.reshape(n, c)


if __name__ == "__main__":
    key = jax.random.PRNGKey(0)

    # Small shape matching the module's expected NCHW input.
    x = jax.random.normal(key, (2, 4, 16, 16), dtype=jnp.float32)
    out = global_avg_pool_2d(x)
    jax.block_until_ready(out)
    ref = x.reshape(2, 4, -1).mean(axis=2)
    assert out.shape == (2, 4)
    assert jnp.allclose(out, ref, atol=1e-5, rtol=1e-5)

    # Ragged-row / non-128-aligned spatial case (exercises the padded-lane mask and the
    # padded-row writeback drop: rows=15 not a multiple of 8, hw=400 not a multiple of 128).
    k2 = jax.random.PRNGKey(1)
    x2 = jax.random.normal(k2, (3, 5, 20, 20), dtype=jnp.float32)
    out2 = global_avg_pool_2d(x2)
    jax.block_until_ready(out2)
    ref2 = x2.reshape(3, 5, -1).mean(axis=2)
    assert out2.shape == (3, 5)
    assert jnp.allclose(out2, ref2, atol=1e-5, rtol=1e-5)

    # bf16 path (16-row sublane packing, f32 accumulation).
    x3 = x.astype(jnp.bfloat16)
    out3 = global_avg_pool_2d(x3)
    jax.block_until_ready(out3)
    ref3 = x3.astype(jnp.float32).reshape(2, 4, -1).mean(axis=2)
    assert out3.shape == (2, 4)
    assert jnp.allclose(out3.astype(jnp.float32), ref3, atol=2e-2, rtol=2e-2)

    # Multi-tile spatial reduction path (hw > one tile, forces several grid steps on
    # the "arbitrary" axis with the resident accumulator).
    k4 = jax.random.PRNGKey(2)
    x4 = jax.random.normal(k4, (2, 8, 64, 64), dtype=jnp.float32)
    out4 = global_avg_pool_2d(x4)
    jax.block_until_ready(out4)
    ref4 = x4.reshape(2, 8, -1).mean(axis=2)
    assert jnp.allclose(out4, ref4, atol=1e-5, rtol=1e-5)

    print("KERNEL_OK")
</pallas_src>

<mosaic_0001>
module attributes {stable_mosaic.version = 11 : i64} {
  func.func @_gap_kernel(%arg0: i32, %arg1: i32, %arg2: memref<8x256xf32, #tpu.memory_space<vmem>>, %arg3: memref<8x1xf32, #tpu.memory_space<vmem>>, %arg4: memref<8x1xf32, #tpu.memory_space<vmem>>) attributes {dimension_semantics = [#tpu.dimension_semantics<parallel>, #tpu.dimension_semantics<arbitrary>], iteration_bounds = array<i64: 1, 1>, scalar_prefetch = 0 : i64, scratch_operands = 1 : i64, tpu.core_type = #tpu.core_type<tc>, window_params = [{transform_indices = @transform_0, window_bounds = array<i64: 8, 256>}, {transform_indices = @transform_1, window_bounds = array<i64: 8, 1>}]} {
    %c0_i32 = arith.constant 0 : i32
    %0 = arith.cmpi eq, %arg1, %c0_i32 : i32
    %1 = arith.extui %0 : i1 to i32
    %c0_i32_0 = arith.constant 0 : i32
    %2 = arith.cmpi ne, %1, %c0_i32_0 : i32
    scf.if %2 {
      %cst_8 = arith.constant 0.000000e+00 : f32
      %12 = vector.broadcast %cst_8 : f32 to vector<8x1xf32>
      %c0_9 = arith.constant 0 : index
      %c0_10 = arith.constant 0 : index
      %13 = vector.load %arg4[%c0_9, %c0_10] : memref<8x1xf32, #tpu.memory_space<vmem>>, vector<8x1xf32>
      tpu.vector_store %arg4[%c0_9, %c0_10], %12 {strides = array<i32>} : memref<8x1xf32, #tpu.memory_space<vmem>>, vector<8x1xf32>,
    } else {
    }
    %c0 = arith.constant 0 : index
    %c0_1 = arith.constant 0 : index
    %3 = vector.load %arg2[%c0, %c0_1] : memref<8x256xf32, #tpu.memory_space<vmem>>, vector<8x256xf32>
    %c0_2 = arith.constant 0 : index
    %c0_3 = arith.constant 0 : index
    %4 = vector.load %arg4[%c0_2, %c0_3] : memref<8x1xf32, #tpu.memory_space<vmem>>, vector<8x1xf32>
    %cst = arith.constant dense<0.000000e+00> : vector<8xf32>
    %5 = vector.multi_reduction <add>, %3, %cst [1] : vector<8x256xf32> to vector<8xf32>
    %6 = vector.shape_cast %5 : vector<8xf32> to vector<8x1xf32>
    %7 = arith.addf %4, %6 : vector<8x1xf32>
    %c0_4 = arith.constant 0 : index
    %c0_5 = arith.constant 0 : index
    %8 = vector.load %arg4[%c0_4, %c0_5] : memref<8x1xf32, #tpu.memory_space<vmem>>, vector<8x1xf32>
    tpu.vector_store %arg4[%c0_4, %c0_5], %7 {strides = array<i32>} : memref<8x1xf32, #tpu.memory_space<vmem>>, vector<8x1xf32>,
    %c0_i32_6 = arith.constant 0 : i32
    %9 = arith.cmpi eq, %arg1, %c0_i32_6 : i32
    %10 = arith.extui %9 : i1 to i32
    %c0_i32_7 = arith.constant 0 : i32
    %11 = arith.cmpi ne, %10, %c0_i32_7 : i32
    scf.if %11 {
      %c0_8 = arith.constant 0 : index
      %c0_9 = arith.constant 0 : index
      %12 = vector.load %arg4[%c0_8, %c0_9] : memref<8x1xf32, #tpu.memory_space<vmem>>, vector<8x1xf32>
      %cst_10 = arith.constant 3.906250e-03 : f32
      %13 = vector.broadcast %cst_10 : f32 to vector<8x1xf32>
      %14 = arith.mulf %12, %13 : vector<8x1xf32>
      %c0_11 = arith.constant 0 : index
      %c0_12 = arith.constant 0 : index
      %15 = vector.load %arg3[%c0_11, %c0_12] : memref<8x1xf32, #tpu.memory_space<vmem>>, vector<8x1xf32>
      tpu.vector_store %arg3[%c0_11, %c0_12], %14 {strides = array<i32>} : memref<8x1xf32, #tpu.memory_space<vmem>>, vector<8x1xf32>,
    } else {
    }
    return
  }
  func.func @transform_0(%arg0: i32, %arg1: i32) -> (i32, i32) {
    %c0_i32 = arith.constant 0 : i32
    return %arg0, %arg1 : i32, i32
  }
  func.func @transform_1(%arg0: i32, %arg1: i32) -> (i32, i32) {
    %c0_i32 = arith.constant 0 : i32
    %c0_i32_0 = arith.constant 0 : i32
    return %arg0, %c0_i32 : i32, i32
  }
}

</mosaic_0001>

<bundles_post_ra>
// kernel: tpu_custom_call.1
= control target key start
LH: loop header
LB: loop body
LE: loop exit
PB: predicated region body
PF: predicated region fallthrough
CT: control target
= control target key end

     0   :  { %6 = vsyncpa [#allocation4], 0  ;;  %s70_s6 = smov [#allocation3]   ;;  %s88_s0 = inlined_call_operand.hbm [shape: f32[8,256], index: 0, kind: input, shape index: {}]   ;;  %s89_s1 = inlined_call_operand.vmem [shape: f32[8,1], index: 1, kind: output, shape index: {}]  }
   0x1   :  { %s13_s7 = sshll.u32 %s70_s6, 4  ;;  %s14_s7 = int_to_ptr.vmem [resolvable:$true] %s13_s7 }
   0x2   :  { %s56_s8 = scalar_lea.vmem %s14_s7, 256  ;;  %p61_p1 = scmp.lt.s32.totalorder %s14_s7, %s14_s7 }
   0x3   :  { %p57_p0 = scmp.ne.s32.totalorder %s14_s7, %s56_s8  ;;  %p62_p2 = scmp.lt.s32.totalorder %s56_s8, %s56_s8 }
   0x5   :  { %p63_p3 = por %p62_p2, %p61_p1 }
   0x7   :  { %p64_p4 = pnand %p63_p3, %p57_p0 }
   0x9   :  { %67 = shalt.err (!%p64_p4)
}
   0xa   :  { %16 = dma.hbm_to_vmem [thread:$0]  %s88_s0, 256, %s14_s7, [#allocation4]  }
   0xb   :  { %68 = dma.done.wait [#allocation4], 256  }
   0xc   :  { %69 = vsyncadd [#allocation4], 4294967040  ;;  %vm24_vm0 = vcmask 7168   ;;  %v71_v0 = vmov 0.0   ;;  %v26_v1 = vld [vmem:[#allocation3] sm:$0xff]  ;;  %v27_v2 = vld [vmem:[#allocation3 + $0x8] sm:$0xff] }
   0xd   :  { %25 = vst.msk [vmem:[#allocation2] sm:$0xff] %vm24_vm0, %v71_v0  ;;  %v29_v3 = vadd.f32 %v27_v2, %v26_v1 }
   0xf   :  { %30 = vadd.xlane.f32.xlu0 %v29_v3 }
  0x14   :  { %v28_v4 = vld [vmem:[#allocation2] sm:$0xff] }
  0x98   :  { %v31_v5 = vpop.xlane.xlu0 %30 }
  0x99   :  { %v32_v6 = vadd.f32 %v31_v5, %v28_v4 }
  0x9b   :  { %34 = vst.msk [vmem:[#allocation2] sm:$0xff] %vm24_vm0, %v32_v6 }
  0xa2   :  { %v38_v7 = vld [vmem:[#allocation2] sm:$0xff] }
  0xa3   :  { %v39_v8 = vmul.f32 0.00390625, %v38_v7 }
  0xa5   :  { %40 = vst.msk [vmem:[%s89_s1] sm:$0xff] %vm24_vm0, %v39_v8 }
  0xa6   :  { %45 = vsyncpa [#allocation4], 1 }

</bundles_post_ra>
